<compile_context>
chip_gen: v6e
topology: v6e:2x2x1
jax: 0.10.0
libtpu: 0.0.40
codegen_flags: <defaults>
</compile_context>

<pallas_src>
import functools
import math

import numpy as np
import jax
import jax.numpy as jnp
from jax.experimental import pallas as pl
from jax.experimental.pallas import tpu as pltpu

MAX_ROW_TILE = 512   # max rows (sublane dim) per grid step
LANE = 128

_PAR = pltpu.CompilerParams(dimension_semantics=("parallel",))


# ----------------------------------------------------------------------------- helpers
def _sigmoid(x):
    return 1.0 / (1.0 + jnp.exp(-x))


def _silu(x):
    return x * _sigmoid(x)


def _dot(a, b):
    # bf16 MXU operands, f32 accumulation (v5e/v6e/v7x bf16 MXU path).
    return jnp.dot(a.astype(jnp.bfloat16), b.astype(jnp.bfloat16),
                   preferred_element_type=jnp.float32)


def _tile_rows(r, max_tile=MAX_ROW_TILE):
    """Pick a sublane-aligned row tile and padded row count with minimal waste."""
    r = max(int(r), 1)
    n = -(-r // max_tile)                 # number of tiles
    tile = -(-r // n)                     # ceil(rows / tiles)
    tile = ((tile + 7) // 8) * 8          # sublane (8) aligned
    return tile, tile * n


def _pad_rows_to(x, rp):
    r = x.shape[0]
    if rp == r:
        return x
    pad = jnp.zeros((rp - r,) + x.shape[1:], x.dtype)
    return jnp.concatenate([x, pad], axis=0)


def _row_spec(tile, d):
    return pl.BlockSpec((tile, d), lambda i: (i, 0))


def _full_spec(shape):
    return pl.BlockSpec(shape, lambda i: (0, 0))


# ----------------------------------------------------------------------------- kernels
def _mlp2_kernel(x_ref, w1_ref, b1_ref, w2_ref, b2_ref, o_ref):
    h = _dot(x_ref[...], w1_ref[...]) + b1_ref[...]
    h = _silu(h)
    o_ref[...] = _dot(h, w2_ref[...]) + b2_ref[...]


def mlp2(x, w1, b1, w2, b2):
    """Linear -> SiLU -> Linear over rows of x, tiled over rows.

    w2 / b2 may be lane-padded by the caller; output width = w2.shape[1]."""
    r, din = x.shape
    dh = w1.shape[1]
    dout = w2.shape[1]
    tile, rp = _tile_rows(r)
    xp = _pad_rows_to(x, rp)
    out = pl.pallas_call(
        _mlp2_kernel,
        out_shape=jax.ShapeDtypeStruct((rp, dout), jnp.float32),
        grid=(rp // tile,),
        in_specs=[
            _row_spec(tile, din),
            _full_spec((din, dh)),
            _full_spec((1, dh)),
            _full_spec((dh, dout)),
            _full_spec((1, dout)),
        ],
        out_specs=_row_spec(tile, dout),
        compiler_params=_PAR,
    )(xp, w1, b1[None, :], w2, b2[None, :])
    return out[:r]


def _edge_kernel(geom_ref, send_ref, filt_ref, wf_ref, bf_ref, out_ref,
                 *, cutoff, n_basis, H):
    geom = geom_ref[...]                                               # (T, 4) [d, ux, uy, uz]
    d = geom[:, 0:1]

    # sinc expansion: sin(pi*n*d/cutoff)/d, n = 1..n_basis (torch.sinc semantics)
    n = (jax.lax.broadcasted_iota(jnp.int32, (1, n_basis), 1) + 1).astype(jnp.float32)
    arg = (d * n) * (math.pi / cutoff)
    safe = jnp.where(arg == 0.0, 1.0, arg)
    sinc = jnp.where(arg == 0.0, 1.0, jnp.sin(safe) / safe)
    edge_state = sinc * (math.pi / cutoff) * n                         # (T, K)

    # cosine (Behler-Parrinello) cutoff
    cut = jnp.where(d < cutoff, 0.5 * (jnp.cos(math.pi / cutoff * d) + 1.0), 0.0)

    # fused filter matmul: wf layout [W_sv | W_ev | W_ns | 0]  -> gates aligned with filt
    fw = _dot(edge_state, wf_ref[...]) + bf_ref[...]                   # (T, 4H)
    gates = fw * cut * filt_ref[...]                                   # filt: [f_sv|f_ev|f_ns|0]
    g_sv = gates[:, :H]
    g_ev = gates[:, H:2 * H]
    g_ns = gates[:, 2 * H:3 * H]

    send = send_ref[...]                                               # (T, 4H) [s|vx|vy|vz]
    s_e = send[:, :H]
    vx = send[:, H:2 * H]
    vy = send[:, 2 * H:3 * H]
    vz = send[:, 3 * H:]

    ux = geom[:, 1:2]
    uy = geom[:, 2:3]
    uz = geom[:, 3:4]

    ms = s_e * g_ns
    mvx = vx * g_sv + g_ev * ux
    mvy = vy * g_sv + g_ev * uy
    mvz = vz * g_sv + g_ev * uz
    out_ref[...] = jnp.concatenate([ms, mvx, mvy, mvz], axis=-1)       # (T, 4H) lane-dense


def edge_messages(geom, send4, filt4, wf_p, bf_p, cutoff, n_basis, H):
    E = geom.shape[0]
    tile, ep = _tile_rows(E)
    geom_p = _pad_rows_to(geom, ep)
    send_p = _pad_rows_to(send4, ep)
    filt_p = _pad_rows_to(filt4, ep)

    kern = functools.partial(_edge_kernel, cutoff=cutoff, n_basis=n_basis, H=H)
    out = pl.pallas_call(
        kern,
        out_shape=jax.ShapeDtypeStruct((ep, 4 * H), jnp.float32),
        grid=(ep // tile,),
        in_specs=[
            _row_spec(tile, 4),
            _row_spec(tile, 4 * H),
            _row_spec(tile, 4 * H),
            _full_spec((n_basis, 4 * H)),
            _full_spec((1, 4 * H)),
        ],
        out_specs=_row_spec(tile, 4 * H),
        compiler_params=_PAR,
    )(geom_p, send_p, filt_p, wf_p, bf_p[None, :])
    return out[:E]


def _node_kernel(msum_ref, state_ref,
                 wg1_ref, bg1_ref, wg2_ref, bg2_ref,
                 wuv_ref, wc1_ref, bc1_ref, wc2_ref, bc2_ref,
                 out_ref, *, H):
    msum = msum_ref[...]                                               # (T, 4H) [ms|mvx|mvy|mvz]
    state = state_ref[...]                                             # (T, 4H) [s|vx|vy|vz]
    T = msum.shape[0]
    ms = msum[:, :H]

    # update_gate_mlp: Linear -> SiLU -> Linear -> Sigmoid.
    # wg2 is host-packed to (H, 4H) = [Ws | Wv | Wv | Wv] so the gate slab is already
    # lane-aligned with the packed state (no in-kernel replication).
    h = _dot(ms, wg1_ref[...]) + bg1_ref[...]
    h = _silu(h)
    g4 = _sigmoid(_dot(h, wg2_ref[...]) + bg2_ref[...])                # (T, 4H)

    new4 = g4 * msum + (1.0 - g4) * state                              # gated state update

    s = new4[:, :H]
    vx = new4[:, H:2 * H]
    vy = new4[:, 2 * H:3 * H]
    vz = new4[:, 3 * H:]

    # PaiNNUpdate: single stacked (3T, H) @ (H, 2H) matmul for all six U/V products.
    v3 = jnp.concatenate([vx, vy, vz], axis=0)                         # (3T, H)
    uv = _dot(v3, wuv_ref[...])                                        # (3T, 2H) [U | V]
    uvx, vvx = uv[:T, :H], uv[:T, H:]
    uvy, vvy = uv[T:2 * T, :H], uv[T:2 * T, H:]
    uvz, vvz = uv[2 * T:, :H], uv[2 * T:, H:]

    vvn = jnp.sqrt(vvx * vvx + vvy * vvy + vvz * vvz)                  # ||Vv|| over xyz

    h2 = _dot(jnp.concatenate([s, vvn], axis=-1), wc1_ref[...]) + bc1_ref[...]
    h2 = _silu(h2)
    a = _dot(h2, wc2_ref[...]) + bc2_ref[...]                          # (T, 3H) [ss|sv|vv]
    a_ss = a[:, :H]
    a_sv = a[:, H:2 * H]
    a_vv = a[:, 2 * H:]

    inner = uvx * vvx + uvy * vvy + uvz * vvz

    out_s = s + a_ss + a_sv * inner
    out_vx = vx + a_vv * uvx
    out_vy = vy + a_vv * uvy
    out_vz = vz + a_vv * uvz
    out_ref[...] = jnp.concatenate([out_s, out_vx, out_vy, out_vz], axis=-1)


def node_update(msum4, state4, lp, H):
    P = state4.shape[0]
    tile, pp = _tile_rows(P)
    m_p = _pad_rows_to(msum4, pp)
    s_p = _pad_rows_to(state4, pp)

    kern = functools.partial(_node_kernel, H=H)
    out = pl.pallas_call(
        kern,
        out_shape=jax.ShapeDtypeStruct((pp, 4 * H), jnp.float32),
        grid=(pp // tile,),
        in_specs=[
            _row_spec(tile, 4 * H), _row_spec(tile, 4 * H),
            _full_spec((H, H)), _full_spec((1, H)),
            _full_spec((H, 4 * H)), _full_spec((1, 4 * H)),
            _full_spec((H, 2 * H)),
            _full_spec((2 * H, H)), _full_spec((1, H)),
            _full_spec((H, 3 * H)), _full_spec((1, 3 * H)),
        ],
        out_specs=_row_spec(tile, 4 * H),
        compiler_params=_PAR,
    )(m_p, s_p,
      lp["wg1"], lp["bg1"][None, :], lp["wg2_4"], lp["bg2_4"][None, :],
      lp["wuv"], lp["wc1"], lp["bc1"][None, :], lp["wc2"], lp["bc2"][None, :])
    return out[:P]


# ----------------------------------------------------------------------------- parameters
def _linear_params(key, din, dout):
    k1, k2 = jax.random.split(key)
    s = 1.0 / math.sqrt(din)
    w = jax.random.uniform(k1, (din, dout), minval=-s, maxval=s, dtype=jnp.float32)
    b = jax.random.uniform(k2, (dout,), minval=-s, maxval=s, dtype=jnp.float32)
    return w, b


def init_params(key, num_interactions, H, K):
    layers = []
    for _ in range(num_interactions):
        key, *ks = jax.random.split(key, 10)
        wf, bf = _linear_params(ks[0], K, 3 * H)          # filter_layer  [sv|ev|ns]
        wm1, bm1 = _linear_params(ks[1], H, H)            # scalar_message_mlp
        wm2, bm2 = _linear_params(ks[2], H, 3 * H)        # [sv|ev|ns]
        wg1, bg1 = _linear_params(ks[3], H, H)            # update_gate_mlp
        wg2, bg2 = _linear_params(ks[4], H, 2 * H)        # [s|v]
        wu, _ = _linear_params(ks[5], H, H)               # PaiNNUpdate.linearU (no bias)
        wv, _ = _linear_params(ks[6], H, H)               # PaiNNUpdate.linearV (no bias)
        wc1, bc1 = _linear_params(ks[7], 2 * H, H)        # combined_mlp
        wc2, bc2 = _linear_params(ks[8], H, 3 * H)        # [ss|sv|vv]
        layers.append(dict(wf=wf, bf=bf, wm1=wm1, bm1=bm1, wm2=wm2, bm2=bm2,
                           wg1=wg1, bg1=bg1, wg2=wg2, bg2=bg2,
                           wu=wu, wv=wv, wc1=wc1, bc1=bc1, wc2=wc2, bc2=bc2))
    key, k1, k2 = jax.random.split(key, 3)
    wr1, br1 = _linear_params(k1, H, H)
    wr2, br2 = _linear_params(k2, H, 1)
    return dict(layers=layers, readout=dict(wr1=wr1, br1=br1, wr2=wr2, br2=br2))


def _pad_cols_to(w, total):
    pad = total - w.shape[1]
    if pad == 0:
        return w
    return jnp.concatenate([w, jnp.zeros((w.shape[0], pad), w.dtype)], axis=1)


def _pad_vec_to(b, total):
    pad = total - b.shape[0]
    if pad == 0:
        return b
    return jnp.concatenate([b, jnp.zeros((pad,), b.dtype)])


def pack_params(params, H):
    """Build lane-dense / fused weight layouts used by the kernels."""
    layers = []
    for lp in params["layers"]:
        layers.append(dict(
            wm1=lp["wm1"], bm1=lp["bm1"],
            wm2_p=_pad_cols_to(lp["wm2"], 4 * H),            # (H, 4H) [sv|ev|ns|0]
            bm2_p=_pad_vec_to(lp["bm2"], 4 * H),
            wf_p=_pad_cols_to(lp["wf"], 4 * H),              # (K, 4H) [sv|ev|ns|0]
            bf_p=_pad_vec_to(lp["bf"], 4 * H),
            wg1=lp["wg1"], bg1=lp["bg1"],
            wg2_4=jnp.concatenate([lp["wg2"][:, :H]] + [lp["wg2"][:, H:]] * 3, axis=1),
            bg2_4=jnp.concatenate([lp["bg2"][:H]] + [lp["bg2"][H:]] * 3),
            wuv=jnp.concatenate([lp["wu"], lp["wv"]], axis=1),   # (H, 2H)
            wc1=lp["wc1"], bc1=lp["bc1"],
            wc2=lp["wc2"], bc2=lp["bc2"],
        ))
    ro = params["readout"]
    readout = dict(wr1=ro["wr1"], br1=ro["br1"],
                   wr2_p=_pad_cols_to(ro["wr2"], LANE),      # lane-dense readout store
                   br2_p=_pad_vec_to(ro["br2"], LANE))
    return dict(layers=layers, readout=readout)


# ----------------------------------------------------------------------------- forward (glue + kernels)
def _unpad_and_cat(padded, lengths):
    return jnp.concatenate([padded[i, : int(l)] for i, l in enumerate(lengths)], axis=0)


def painn_probe_forward(input_dict, atom_rep_scalar, atom_rep_vector, packed, cutoff, H, K):
    num_nodes = np.asarray(input_dict["num_nodes"])
    num_probes = np.asarray(input_dict["num_probes"])
    num_pe = np.asarray(input_dict["num_probe_edges"])
    B = int(num_nodes.shape[0])

    atom_xyz = _unpad_and_cat(input_dict["atom_xyz"], num_nodes)
    probe_xyz = _unpad_and_cat(input_dict["probe_xyz"], num_probes)

    atom_off = np.concatenate([[0], np.cumsum(num_nodes)[:-1]]).astype(np.int32)
    probe_off = np.concatenate([[0], np.cumsum(num_probes)[:-1]]).astype(np.int32)
    offset = jnp.asarray(np.stack([atom_off, probe_off], axis=1))[:, None, :]       # (B,1,2)
    probe_edges = _unpad_and_cat(input_dict["probe_edges"] + offset, num_pe)         # (E,2)
    ped = _unpad_and_cat(input_dict["probe_edges_displacement"], num_pe)             # (E,3)

    cells_rep = jnp.asarray(np.repeat(np.asarray(input_dict["cell"]), num_pe, axis=0))
    offsets = jnp.einsum("ej,ejk->ek", ped, cells_rep)
    snd = probe_edges[:, 0]
    rcv = probe_edges[:, 1]
    # receiver - (sender + displacement), as in DeepDFT's calc_distance_to_probe
    diff = probe_xyz[rcv] - (atom_xyz[snd] + offsets)
    dist = jnp.sqrt(jnp.sum(diff * diff, axis=1, keepdims=True))                     # (E,1)
    unit = diff / jnp.maximum(dist, 1e-12)                                            # (E,3)
    geom = jnp.concatenate([dist, unit], axis=1)                                      # (E,4)

    P = int(num_probes.sum())
    probe_state4 = jnp.zeros((P, 4 * H), jnp.float32)        # packed [s | vx | vy | vz]

    for t, lp in enumerate(packed["layers"]):
        atom_s = atom_rep_scalar[t]                          # (N, H)
        atom_v = atom_rep_vector[t]                          # (N, 3, H)
        N = atom_s.shape[0]

        # per-atom packed sender features [s|vx|vy|vz] and filter MLP (Pallas)
        apack = jnp.concatenate([atom_s[:, None, :], atom_v], axis=1).reshape(N, 4 * H)
        atom_filt = mlp2(atom_s, lp["wm1"], lp["bm1"], lp["wm2_p"], lp["bm2_p"])      # (N, 4H)

        # per-edge gathers (JAX glue)
        send4 = apack[snd]
        filt4 = atom_filt[snd]

        msg = edge_messages(geom, send4, filt4, lp["wf_p"], lp["bf_p"],
                            cutoff, K, H)                                             # (E, 4H)

        # TODO(synk): move the scatter-add into a sorted/segmented Pallas reduction with
        # scalar-prefetched receiver offsets; for now a single packed 128-lane JAX scatter.
        msum4 = jnp.zeros((P, 4 * H), jnp.float32).at[rcv].add(msg)

        probe_state4 = node_update(msum4, probe_state4, lp, H)

    ro = packed["readout"]
    probe_s = probe_state4[:, :H]
    probe_out = mlp2(probe_s, ro["wr1"], ro["br1"], ro["wr2_p"], ro["br2_p"])[:, 0]   # (P,)

    # pad_and_stack
    maxp = int(num_probes.max())
    out = jnp.zeros((B, maxp), jnp.float32)
    off = 0
    for b in range(B):
        n = int(num_probes[b])
        out = out.at[b, :n].set(probe_out[off:off + n])
        off += n

    # TODO(synk): compute_iri / compute_dori / compute_hessian branches (autograd wrt probe_xyz) not implemented.
    return out


# ----------------------------------------------------------------------------- demo
if __name__ == "__main__":
    num_interactions = 2
    H = 32            # hidden_state_size
    K = 16            # distance_embedding_size
    cutoff = 4.0
    B = 2

    num_nodes = np.array([5, 7], np.int32)
    num_probes = np.array([10, 8], np.int32)
    num_probe_edges = np.array([20, 24], np.int32)
    max_atoms = int(num_nodes.max())
    max_probes = int(num_probes.max())
    max_pe = int(num_probe_edges.max())
    N_total = int(num_nodes.sum())

    key = jax.random.PRNGKey(0)
    keys = jax.random.split(key, 16)

    atom_xyz = jax.random.uniform(keys[0], (B, max_atoms, 3), minval=0.0, maxval=3.0)
    probe_xyz = jax.random.uniform(keys[1], (B, max_probes, 3), minval=0.0, maxval=3.0)
    cell = jnp.tile((jnp.eye(3, dtype=jnp.float32) * 4.0)[None], (B, 1, 1))
    probe_edges_displacement = jnp.zeros((B, max_pe, 3), jnp.float32)

    pe = np.zeros((B, max_pe, 2), np.int32)
    for b in range(B):
        ka, kp = jax.random.split(jax.random.fold_in(keys[2], b))
        n_e = int(num_probe_edges[b])
        pe[b, :n_e, 0] = np.asarray(jax.random.randint(ka, (n_e,), 0, int(num_nodes[b])))
        pe[b, :n_e, 1] = np.asarray(jax.random.randint(kp, (n_e,), 0, int(num_probes[b])))
    probe_edges = jnp.asarray(pe)

    input_dict = dict(
        atom_xyz=atom_xyz, probe_xyz=probe_xyz, cell=cell,
        probe_edges=probe_edges, probe_edges_displacement=probe_edges_displacement,
        num_nodes=num_nodes, num_probes=num_probes, num_probe_edges=num_probe_edges,
    )

    atom_rep_scalar = [jax.random.normal(jax.random.fold_in(keys[3], t), (N_total, H), jnp.float32)
                       for t in range(num_interactions)]
    atom_rep_vector = [0.1 * jax.random.normal(jax.random.fold_in(keys[4], t), (N_total, 3, H), jnp.float32)
                       for t in range(num_interactions)]

    params = init_params(keys[5], num_interactions, H, K)
    packed = pack_params(params, H)

    out = painn_probe_forward(input_dict, atom_rep_scalar, atom_rep_vector,
                              packed, cutoff, H, K)
    out = jax.block_until_ready(out)
    assert out.shape == (B, max_probes)
    assert bool(jnp.all(jnp.isfinite(out)))
    print("KERNEL_OK")
</pallas_src>

<mosaic_0001>
module attributes {stable_mosaic.version = 11 : i64} {
  func.func @_mlp2_kernel(%arg0: i32, %arg1: memref<16x32xf32, #tpu.memory_space<vmem>>, %arg2: memref<32x32xf32, #tpu.memory_space<vmem>>, %arg3: memref<1x32xf32, #tpu.memory_space<vmem>>, %arg4: memref<32x128xf32, #tpu.memory_space<vmem>>, %arg5: memref<1x128xf32, #tpu.memory_space<vmem>>, %arg6: memref<16x128xf32, #tpu.memory_space<vmem>>) attributes {dimension_semantics = [#tpu.dimension_semantics<parallel>], iteration_bounds = array<i64: 1>, scalar_prefetch = 0 : i64, scratch_operands = 0 : i64, tpu.core_type = #tpu.core_type<tc>, window_params = [{transform_indices = @transform_0, window_bounds = array<i64: 16, 32>}, {pipeline_mode = #tpu.pipeline_mode<synchronous>, transform_indices = @transform_1, window_bounds = array<i64: 32, 32>}, {pipeline_mode = #tpu.pipeline_mode<synchronous>, transform_indices = @transform_2, window_bounds = array<i64: 1, 32>}, {pipeline_mode = #tpu.pipeline_mode<synchronous>, transform_indices = @transform_3, window_bounds = array<i64: 32, 128>}, {pipeline_mode = #tpu.pipeline_mode<synchronous>, transform_indices = @transform_4, window_bounds = array<i64: 1, 128>}, {transform_indices = @transform_5, window_bounds = array<i64: 16, 128>}]} {
    %c0 = arith.constant 0 : index
    %c0_0 = arith.constant 0 : index
    %0 = vector.load %arg1[%c0, %c0_0] : memref<16x32xf32, #tpu.memory_space<vmem>>, vector<16x32xf32>
    %c0_1 = arith.constant 0 : index
    %c0_2 = arith.constant 0 : index
    %1 = vector.load %arg2[%c0_1, %c0_2] : memref<32x32xf32, #tpu.memory_space<vmem>>, vector<32x32xf32>
    %2 = arith.truncf %0 : vector<16x32xf32> to vector<16x32xbf16>
    %3 = arith.truncf %1 : vector<32x32xf32> to vector<32x32xbf16>
    %cst = arith.constant dense<0.000000e+00> : vector<16x32xf32>
    %4 = tpu.matmul %2, %3, %cst {dimension_numbers = #tpu.dot_dimension_numbers<[1], [0], [0], [1], [0, 0, 1, 1], [], []>} : vector<16x32xbf16>, vector<32x32xbf16>, vector<16x32xf32> -> vector<16x32xf32>
    %c0_3 = arith.constant 0 : index
    %c0_4 = arith.constant 0 : index
    %5 = vector.load %arg3[%c0_3, %c0_4] : memref<1x32xf32, #tpu.memory_space<vmem>>, vector<1x32xf32>
    %6 = vector.broadcast %5 : vector<1x32xf32> to vector<16x32xf32>
    %7 = arith.addf %4, %6 : vector<16x32xf32>
    %cst_5 = arith.constant 0.000000e+00 : f32
    %8 = vector.broadcast %cst_5 : f32 to vector<16x32xf32>
    %9 = arith.subf %8, %7 : vector<16x32xf32>
    %10 = math.exp %9 : vector<16x32xf32>
    %cst_6 = arith.constant 1.000000e+00 : f32
    %11 = vector.broadcast %cst_6 : f32 to vector<16x32xf32>
    %12 = arith.addf %11, %10 : vector<16x32xf32>
    %cst_7 = arith.constant 1.000000e+00 : f32
    %13 = vector.broadcast %cst_7 : f32 to vector<16x32xf32>
    %14 = arith.divf %13, %12 : vector<16x32xf32>
    %15 = arith.mulf %7, %14 : vector<16x32xf32>
    %c0_8 = arith.constant 0 : index
    %c0_9 = arith.constant 0 : index
    %16 = vector.load %arg4[%c0_8, %c0_9] : memref<32x128xf32, #tpu.memory_space<vmem>>, vector<32x128xf32>
    %17 = arith.truncf %15 : vector<16x32xf32> to vector<16x32xbf16>
    %18 = arith.truncf %16 : vector<32x128xf32> to vector<32x128xbf16>
    %cst_10 = arith.constant dense<0.000000e+00> : vector<16x128xf32>
    %19 = tpu.matmul %17, %18, %cst_10 {dimension_numbers = #tpu.dot_dimension_numbers<[1], [0], [0], [1], [0, 0, 1, 1], [], []>} : vector<16x32xbf16>, vector<32x128xbf16>, vector<16x128xf32> -> vector<16x128xf32>
    %c0_11 = arith.constant 0 : index
    %c0_12 = arith.constant 0 : index
    %20 = vector.load %arg5[%c0_11, %c0_12] : memref<1x128xf32, #tpu.memory_space<vmem>>, vector<1x128xf32>
    %21 = vector.broadcast %20 : vector<1x128xf32> to vector<16x128xf32>
    %22 = arith.addf %19, %21 : vector<16x128xf32>
    %c0_13 = arith.constant 0 : index
    %c0_14 = arith.constant 0 : index
    %23 = vector.load %arg6[%c0_13, %c0_14] : memref<16x128xf32, #tpu.memory_space<vmem>>, vector<16x128xf32>
    tpu.vector_store %arg6[%c0_13, %c0_14], %22 {strides = array<i32>} : memref<16x128xf32, #tpu.memory_space<vmem>>, vector<16x128xf32>,
    return
  }
  func.func @transform_0(%arg0: i32) -> (i32, i32) {
    %c0_i32 = arith.constant 0 : i32
    %c0_i32_0 = arith.constant 0 : i32
    return %arg0, %c0_i32 : i32, i32
  }
  func.func @transform_1(%arg0: i32) -> (i32, i32) {
    %c0_i32 = arith.constant 0 : i32
    %c0_i32_0 = arith.constant 0 : i32
    %c0_i32_1 = arith.constant 0 : i32
    return %c0_i32, %c0_i32_0 : i32, i32
  }
  func.func @transform_2(%arg0: i32) -> (i32, i32) {
    %c0_i32 = arith.constant 0 : i32
    %c0_i32_0 = arith.constant 0 : i32
    %c0_i32_1 = arith.constant 0 : i32
    return %c0_i32, %c0_i32_0 : i32, i32
  }
  func.func @transform_3(%arg0: i32) -> (i32, i32) {
    %c0_i32 = arith.constant 0 : i32
    %c0_i32_0 = arith.constant 0 : i32
    %c0_i32_1 = arith.constant 0 : i32
    return %c0_i32, %c0_i32_0 : i32, i32
  }
  func.func @transform_4(%arg0: i32) -> (i32, i32) {
    %c0_i32 = arith.constant 0 : i32
    %c0_i32_0 = arith.constant 0 : i32
    %c0_i32_1 = arith.constant 0 : i32
    return %c0_i32, %c0_i32_0 : i32, i32
  }
  func.func @transform_5(%arg0: i32) -> (i32, i32) {
    %c0_i32 = arith.constant 0 : i32
    %c0_i32_0 = arith.constant 0 : i32
    return %arg0, %c0_i32 : i32, i32
  }
}

</mosaic_0001>

<bundles_post_ra>
// kernel: tpu_custom_call.1
= control target key start
LH: loop header
LB: loop body
LE: loop exit
PB: predicated region body
PF: predicated region fallthrough
CT: control target
= control target key end

     0   :  { %10 = vsyncpa [#allocation3], 0  ;;  %s414_s0 = inlined_call_operand.hbm [shape: f32[16,32], index: 0, kind: input, shape index: {}]   ;;  %s415_s1 = inlined_call_operand.hbm [shape: f32[32,32], index: 1, kind: input, shape index: {}]   ;;  %s416_s2 = inlined_call_operand.vmem [shape: f32[1,32], index: 2, kind: input, shape index: {}]   ;;  %s417_s3 = inlined_call_operand.hbm [shape: f32[32,128], index: 3, kind: input, shape index: {}]   ;;  %s418_s4 = inlined_call_operand.vmem [shape: f32[1,128], index: 4, kind: input, shape index: {}]   ;;  %s419_s5 = inlined_call_operand.hbm [shape: f32[16,128], index: 5, kind: output, shape index: {}]  }
   0x1   :  { %11 = vsyncpa [#allocation6], 0 }
   0x2   :  { %12 = vsyncpa [#allocation4], 0  ;;  %s344_s18 = smov [#allocation5]   ;;  %s345_s20 = smov [#allocation2]  }
   0x3   :  { %s30_s19 = sshll.u32 %s344_s18, 4  ;;  %s18_s21 = sshll.u32 %s345_s20, 4  ;;  %s31_s19 = int_to_ptr.vmem [resolvable:$true] %s30_s19  ;;  %s19_s21 = int_to_ptr.vmem [resolvable:$true] %s18_s21 }
   0x4   :  { %s266_s22 = scalar_lea.vmem %s31_s19, 512  ;;  %p271_p1 = scmp.lt.s32.totalorder %s31_s19, %s31_s19 }
   0x5   :  { %p267_p0 = scmp.ne.s32.totalorder %s31_s19, %s266_s22  ;;  %p272_p2 = scmp.lt.s32.totalorder %s266_s22, %s266_s22 }
   0x7   :  { %p273_p3 = por %p272_p2, %p271_p1 }
   0x9   :  { %p274_p4 = pnand %p273_p3, %p267_p0 }
   0xb   :  { %277 = shalt.err (!%p274_p4)
}
   0xc   :  { %s346_s23 = smov 128   ;;  %s347_s24 = smov 8  }
   0xd   :  { %36 = dma.hbm_to_vmem [thread:$0]  %s415_s1, 512, %s31_s19, [#allocation6], %s346_s23, %s346_s23, %s347_s24  }
   0xe   :  { %s286_s27 = scalar_lea.vmem %s19_s21, 256  ;;  %p291_p6 = scmp.lt.s32.totalorder %s19_s21, %s19_s21 }
   0xf   :  { %p287_p5 = scmp.ne.s32.totalorder %s19_s21, %s286_s27  ;;  %p292_p7 = scmp.lt.s32.totalorder %s286_s27, %s286_s27 }
  0x11   :  { %p293_p8 = por %p292_p7, %p291_p6 }
  0x13   :  { %p294_p9 = pnand %p293_p8, %p287_p5 }
  0x15   :  { %297 = shalt.err (!%p294_p9)
}
  0x16   :  { %24 = dma.hbm_to_vmem [thread:$0]  %s414_s0, 256, %s19_s21, [#allocation3], %s346_s23, %s346_s23, %s347_s24  }
  0x17   :  { %s348_s30 = smov [#allocation7]  }
  0x18   :  { %s44_s6 = sshll.u32 %s348_s30, 4  ;;  %s45_s6 = int_to_ptr.vmem [resolvable:$true] %s44_s6 }
  0x19   :  { %s306_s7 = scalar_lea.vmem %s45_s6, 512  ;;  %p311_p11 = scmp.lt.s32.totalorder %s45_s6, %s45_s6 }
  0x1a   :  { %p307_p10 = scmp.ne.s32.totalorder %s45_s6, %s306_s7  ;;  %p312_p12 = scmp.lt.s32.totalorder %s306_s7, %s306_s7 }
  0x1c   :  { %p313_p13 = por %p312_p12, %p311_p11 }
  0x1e   :  { %p314_p0 = pnand %p313_p13, %p307_p10 }
  0x20   :  { %317 = shalt.err (!%p314_p0)
}
  0x21   :  { %50 = dma.hbm_to_vmem [thread:$0]  %s417_s3, 512, %s45_s6, [#allocation6], %s346_s23, %s346_s23, %s347_s24  }
  0x22   :  { %338 = dma.done.wait [#allocation3], 256  }
  0x23   :  { %339 = vsyncadd [#allocation3], 4294967040 }
  0x24   :  { %340 = dma.done.wait [#allocation6], 1024  }
  0x25   :  { %341 = vsyncadd [#allocation6], 4294966272  ;;  %v349_v0 = vmov 0.0   ;;  %vm350_vm0 = vmmov 0   ;;  %v67_v1 = vld [vmem:[#allocation5 + $0x10] sm:$0xff]  ;;  %v68_v2 = vld [vmem:[#allocation5 + $0x18] sm:$0xff] }
  0x26   :  { %226 = vmatprep.subr.bf16.mxu0 %v349_v0  ;;  %230 = vmatprep.mubr.msk.bf16.mxu0 %vm350_vm0, %v349_v0  ;;  %v65_v3 = vld [vmem:[#allocation5] sm:$0xff]  ;;  %v71_v4 = vpack.c.bf16 %v68_v2, %v67_v1  ;;  %v66_v5 = vld [vmem:[#allocation5 + $0x8] sm:$0xff]  ;;  %v63_v7 = vld [vmem:[#allocation2] sm:$0xff]  ;;  %vm79_vm1 = vcmask 261120   ;;  %s351_s10 = smov [#allocation8]  }
  0x27   :  { %234 = vmatprep.subr.bf16.mxu1 %v349_v0  ;;  %238 = vmatprep.mubr.msk.bf16.mxu1 %vm350_vm0, %v349_v0  ;;  %v70_v6 = vpack.c.bf16 %v66_v5, %v65_v3  ;;  %v64_v8 = vld [vmem:[#allocation2 + $0x8] sm:$0xff]  ;;  %v140_v10 = vld [vmem:[#allocation7 + $0x10] sm:$0xff]  ;;  %v138_v13 = vld [vmem:[#allocation7] sm:$0xff]  ;;  %s203_s11 = sshll.u32 %s351_s10, 4  ;;  %s204_s11 = int_to_ptr.vmem [resolvable:$true] %s203_s11 }
  0x28   :  { %227 = vmatpush3.bf16.msra.mxu0 %v71_v4  ;;  %v69_v9 = vpack.c.bf16 %v64_v8, %v63_v7  ;;  %v141_v11 = vld [vmem:[#allocation7 + $0x18] sm:$0xff]  ;;  %v139_v14 = vld [vmem:[#allocation7 + $0x8] sm:$0xff]  ;;  %v216_v16 = vld [vmem:[%s416_s2] ss:$0 sm:$0xff]  ;;  %s318_s12 = scalar_lea.vmem %s204_s11, 256  ;;  %p323_p2 = scmp.lt.s32.totalorder %s204_s11, %s204_s11 }
  0x29   :  { %228 = vmatprep.subr.bf16.mxu0 %v349_v0  ;;  %v144_v12 = vpack.c.bf16 %v141_v11, %v140_v10  ;;  %v143_v15 = vpack.c.bf16 %v139_v14, %v138_v13  ;;  %v218_v36 = vld [vmem:[%s418_s4] ss:$0 sm:$0xff]  ;;  %p319_p1 = scmp.ne.s32.totalorder %s204_s11, %s318_s12  ;;  %p324_p3 = scmp.lt.s32.totalorder %s318_s12, %s318_s12 }
  0x2b   :  { %235 = vmatpush3.bf16.msra.mxu1 %v144_v12  ;;  %p325_p4 = por %p324_p3, %p323_p2 }
  0x2c   :  { %229 = vmatpush3.bf16.msra.mxu0 %v70_v6  ;;  %236 = vmatprep.subr.bf16.mxu1 %v349_v0 }
  0x2d   :  { %p326_p5 = pnand %p325_p4, %p319_p1 }
  0x2f   :  { %231 = vmatmul.mubr.msk.bf16.vlgmr.msra.gmra.mxu0 %vm79_vm1, %v69_v9  ;;  %237 = vmatpush3.bf16.msra.mxu1 %v143_v15 }
  0xef   :  { %v117_v17 = vpop.f32.mrf.mxu0 }
  0xf0   :  { %v118_v18 = vadd.f32 %v216_v16, %v117_v17 }
  0xf1   :  { %v232_v19 = vpop.f32.mrf.mxu0 }
  0xf2   :  { %v124_v20 = vsub.f32 0.0, %v118_v18 }
  0xf3   :  { %v120_v21 = vpop.f32.mrf.mxu0 }
  0xf4   :  { %v126_v22 = vmul.f32 1.442695, %v124_v20  ;;  %v121_v23 = vadd.f32 %v216_v16, %v120_v21 }
  0xf5   :  { %v233_v24 = vpop.f32.mrf.mxu0 }
  0xf6   :  { %250 = vpow2.f32 %v126_v22  ;;  %v125_v25 = vsub.f32 0.0, %v121_v23 }
  0xf8   :  { %v128_v26 = vmul.f32 1.442695, %v125_v25 }
  0xfa   :  { %252 = vpow2.f32 %v128_v26 }
 0x103   :  { %v251_v27 = vpop.eup %250 }
 0x104   :  { %v130_v28 = vadd.f32 1.0, %v251_v27 }
 0x106   :  { %254 = vrcp.f32 %v130_v28 }
 0x107   :  { %v253_v29 = vpop.eup %252 }
 0x108   :  { %v131_v30 = vadd.f32 1.0, %v253_v29 }
 0x10a   :  { %256 = vrcp.f32 %v131_v30 }
 0x113   :  { %v255_v31 = vpop.eup %254 }
 0x114   :  { %v136_v33 = vmul.f32 %v255_v31, %v118_v18 }
 0x117   :  { %v257_v32 = vpop.eup %256 }
 0x118   :  { %v137_v34 = vmul.f32 %v257_v32, %v121_v23 }
 0x11a   :  { %v142_v35 = vpack.c.bf16 %v137_v34, %v136_v33 }
 0x11c   :  { %239 = vmatmul.mubr.msk.bf16.vlgmr.msra.gmra.mxu1 %vm79_vm1, %v142_v35 }
 0x1dc   :  { %v189_v37 = vpop.f32.mrf.mxu1 }
 0x1dd   :  { %v190_v38 = vadd.f32 %v218_v36, %v189_v37 }
 0x1de   :  { %v240_v39 = vpop.f32.mrf.mxu1 }
 0x1df   :  { %196 = vst [vmem:[#allocation8] sm:$0xff] %v190_v38 }
 0x1e0   :  { %v192_v40 = vpop.f32.mrf.mxu1 }
 0x1e1   :  { %v193_v41 = vadd.f32 %v218_v36, %v192_v40 }
 0x1e2   :  { %v241_v42 = vpop.f32.mrf.mxu1 }
 0x1e3   :  { %197 = vst [vmem:[#allocation8 + $0x8] sm:$0xff] %v193_v41 }
 0x1e4   :  { %329 = shalt.err (!%p326_p5)
}
 0x1e5   :  { %209 = dma.vmem_to_hbm [thread:$0]  %s204_s11, 256, %s419_s5, [#allocation4], %s346_s23, %s346_s23, %s347_s24  }
 0x1e6   :  { %342 = dma.done.wait [#allocation4], 256  }
 0x1e7   :  { %343 = vsyncadd [#allocation4], 4294967040 }
 0x1e8   :  { %213 = vsyncpa [#allocation3], 1 }
 0x1e9   :  { %214 = vsyncpa [#allocation6], 1 }
 0x1ea   :  { %215 = vsyncpa [#allocation4], 1 }

</bundles_post_ra>
